<compile_context>
chip_gen: v7x
topology: tpu7x:2x2x1
jax: 0.10.0
libtpu: 0.0.40
codegen_flags: <defaults>
</compile_context>

<pallas_src>
import functools

import jax
import jax.numpy as jnp
from jax.experimental import pallas as pl
from jax.experimental.pallas import tpu as pltpu

_LANE = 128
_TARGET_BLOCK_ROWS = 4096  # (4096, 128) f32 = 2 MiB block


def _sinemish_kernel(x_ref, o_ref, *, alpha, beta, gamma):
    x = x_ref[...].astype(jnp.float32)

    # Shared exponential (EUP op #1): e = exp(-|x|) -- never overflows.
    e = jnp.exp(-jnp.abs(x))
    e2 = e * e
    pos = x >= 0.0

    # tanh(softplus(x)) = num / den (branch picked so only exp(-|x|) is needed)
    num = jnp.where(pos, 1.0 + 2.0 * e, e2 + 2.0 * e)
    den = jnp.where(pos, 1.0 + 2.0 * e + 2.0 * e2, e2 + 2.0 * e + 2.0)

    s = jnp.sin(beta * x)  # EUP op #2

    if gamma == 1.0:
        # sigmoid(-x) = sel / (1 + e), sel = e for x>=0 else 1 -> reuse e.
        sel = jnp.where(pos, e, 1.0)
        one_p_e = 1.0 + e
        # mish + alpha*sig*sin over a single common denominator -> one divide.
        numer = x * num * one_p_e + alpha * sel * den * s
        denom = den * one_p_e
        out = numer / denom  # EUP op #3
    else:
        sig = jax.nn.sigmoid(-gamma * x)
        out = x * num / den + alpha * sig * s

    o_ref[...] = out.astype(o_ref.dtype)


def _pick_block_rows(rows):
    """Block-rows choice: big blocks, multiple of 8, >=2 grid steps if possible."""
    if rows <= 8:
        return rows  # block spans the full (tiny) array -> allowed
    br = min(rows, _TARGET_BLOCK_ROWS)
    br -= br % 8
    if br >= rows and rows >= 16:
        # Split small inputs into (at least) 2 grid steps so the "parallel"
        # axis can be sharded across both v7x TensorCores.
        half = rows // 2
        br = max(8, half - half % 8)
    return max(8, br)


def sinemish(x, alpha=0.2, beta=float(jnp.pi), gamma=1.0):
    """Elementwise SineMish. Accepts any shape; computes in a Pallas kernel."""
    orig_shape = x.shape
    orig_dtype = x.dtype
    n = x.size

    flat = jnp.reshape(x, (-1,))
    if n % _LANE != 0:
        # Rare ragged path: pad only the tail up to the next 128 boundary.
        # TODO(synk): handle the ragged tail with an in-kernel masked store to
        # avoid this XLA-side pad/slice round trip.
        pad = _LANE - (n % _LANE)
        flat = jnp.concatenate([flat, jnp.zeros((pad,), dtype=orig_dtype)])
    rows = flat.size // _LANE
    x2d = jnp.reshape(flat, (rows, _LANE))

    block_rows = _pick_block_rows(rows)
    grid = (pl.cdiv(rows, block_rows),)

    kernel = functools.partial(
        _sinemish_kernel, alpha=float(alpha), beta=float(beta), gamma=float(gamma)
    )

    elem_bytes = jnp.dtype(orig_dtype).itemsize
    cost = pl.CostEstimate(
        flops=20 * rows * _LANE,
        transcendentals=3 * rows * _LANE,
        bytes_accessed=2 * rows * _LANE * elem_bytes,
    )

    out2d = pl.pallas_call(
        kernel,
        out_shape=jax.ShapeDtypeStruct((rows, _LANE), orig_dtype),
        grid_spec=pltpu.PrefetchScalarGridSpec(
            num_scalar_prefetch=0,
            grid=grid,
            in_specs=[pl.BlockSpec((block_rows, _LANE), lambda i: (i, 0))],
            out_specs=pl.BlockSpec((block_rows, _LANE), lambda i: (i, 0)),
        ),
        compiler_params=pltpu.CompilerParams(
            dimension_semantics=("parallel",),
        ),
        cost_estimate=cost,
    )(x2d)

    out_flat = jnp.reshape(out2d, (-1,))
    if out_flat.size != n:
        out_flat = out_flat[:n]
    return jnp.reshape(out_flat, orig_shape)


def _sinemish_ref(x, alpha=0.2, beta=float(jnp.pi), gamma=1.0):
    """Pure-JAX reference matching the PyTorch module formulation."""
    xf = x.astype(jnp.float32)
    sp = jnp.log1p(jnp.exp(-jnp.abs(xf))) + jnp.maximum(xf, 0.0)  # softplus
    mish = xf * jnp.tanh(sp)
    sig = jax.nn.sigmoid(-gamma * xf)
    return (mish + alpha * sig * jnp.sin(beta * xf)).astype(x.dtype)


if __name__ == "__main__":
    key = jax.random.PRNGKey(0)
    x = jax.random.normal(key, (2, 4, 16, 16), dtype=jnp.float32)  # NCHW-like

    out = sinemish(x)
    out = jax.block_until_ready(out)

    ref = _sinemish_ref(x)
    assert out.shape == x.shape and out.dtype == x.dtype
    assert jnp.allclose(out, ref, atol=1e-5, rtol=1e-5)

    print("KERNEL_OK")
</pallas_src>

<mosaic_0001>
module attributes {stable_mosaic.version = 11 : i64} {
  func.func @_sinemish_kernel(%arg0: i32, %arg1: memref<8x128xf32, #tpu.memory_space<vmem>>, %arg2: memref<8x128xf32, #tpu.memory_space<vmem>>) attributes {dimension_semantics = [#tpu.dimension_semantics<parallel>], iteration_bounds = array<i64: 2>, scalar_prefetch = 0 : i64, scratch_operands = 0 : i64, tpu.core_type = #tpu.core_type<tc>, window_params = [{transform_indices = @transform_0, window_bounds = array<i64: 8, 128>}, {transform_indices = @transform_1, window_bounds = array<i64: 8, 128>}]} {
    %c0 = arith.constant 0 : index
    %c0_0 = arith.constant 0 : index
    %0 = vector.load %arg1[%c0, %c0_0] : memref<8x128xf32, #tpu.memory_space<vmem>>, vector<8x128xf32>
    %1 = math.absf %0 : vector<8x128xf32>
    %cst = arith.constant 0.000000e+00 : f32
    %2 = vector.broadcast %cst : f32 to vector<8x128xf32>
    %3 = arith.subf %2, %1 : vector<8x128xf32>
    %4 = math.exp %3 : vector<8x128xf32>
    %5 = arith.mulf %4, %4 : vector<8x128xf32>
    %cst_1 = arith.constant 0.000000e+00 : f32
    %6 = vector.broadcast %cst_1 : f32 to vector<8x128xf32>
    %7 = arith.cmpf oge, %0, %6 : vector<8x128xf32>
    %cst_2 = arith.constant 2.000000e+00 : f32
    %8 = vector.broadcast %cst_2 : f32 to vector<8x128xf32>
    %9 = arith.mulf %8, %4 : vector<8x128xf32>
    %cst_3 = arith.constant 1.000000e+00 : f32
    %10 = vector.broadcast %cst_3 : f32 to vector<8x128xf32>
    %11 = arith.addf %10, %9 : vector<8x128xf32>
    %cst_4 = arith.constant 2.000000e+00 : f32
    %12 = vector.broadcast %cst_4 : f32 to vector<8x128xf32>
    %13 = arith.mulf %12, %4 : vector<8x128xf32>
    %14 = arith.addf %5, %13 : vector<8x128xf32>
    %15 = arith.select %7, %11, %14 : vector<8x128xi1>, vector<8x128xf32>
    %cst_5 = arith.constant 2.000000e+00 : f32
    %16 = vector.broadcast %cst_5 : f32 to vector<8x128xf32>
    %17 = arith.mulf %16, %4 : vector<8x128xf32>
    %cst_6 = arith.constant 1.000000e+00 : f32
    %18 = vector.broadcast %cst_6 : f32 to vector<8x128xf32>
    %19 = arith.addf %18, %17 : vector<8x128xf32>
    %cst_7 = arith.constant 2.000000e+00 : f32
    %20 = vector.broadcast %cst_7 : f32 to vector<8x128xf32>
    %21 = arith.mulf %20, %5 : vector<8x128xf32>
    %22 = arith.addf %19, %21 : vector<8x128xf32>
    %cst_8 = arith.constant 2.000000e+00 : f32
    %23 = vector.broadcast %cst_8 : f32 to vector<8x128xf32>
    %24 = arith.mulf %23, %4 : vector<8x128xf32>
    %25 = arith.addf %5, %24 : vector<8x128xf32>
    %cst_9 = arith.constant 2.000000e+00 : f32
    %26 = vector.broadcast %cst_9 : f32 to vector<8x128xf32>
    %27 = arith.addf %25, %26 : vector<8x128xf32>
    %28 = arith.select %7, %22, %27 : vector<8x128xi1>, vector<8x128xf32>
    %cst_10 = arith.constant 3.14159274 : f32
    %29 = vector.broadcast %cst_10 : f32 to vector<8x128xf32>
    %30 = arith.mulf %29, %0 : vector<8x128xf32>
    %31 = math.sin %30 : vector<8x128xf32>
    %cst_11 = arith.constant 1.000000e+00 : f32
    %32 = vector.broadcast %cst_11 : f32 to vector<8x128xf32>
    %33 = arith.select %7, %4, %32 : vector<8x128xi1>, vector<8x128xf32>
    %cst_12 = arith.constant 1.000000e+00 : f32
    %34 = vector.broadcast %cst_12 : f32 to vector<8x128xf32>
    %35 = arith.addf %34, %4 : vector<8x128xf32>
    %36 = arith.mulf %0, %15 : vector<8x128xf32>
    %37 = arith.mulf %36, %35 : vector<8x128xf32>
    %cst_13 = arith.constant 2.000000e-01 : f32
    %38 = vector.broadcast %cst_13 : f32 to vector<8x128xf32>
    %39 = arith.mulf %38, %33 : vector<8x128xf32>
    %40 = arith.mulf %39, %28 : vector<8x128xf32>
    %41 = arith.mulf %40, %31 : vector<8x128xf32>
    %42 = arith.addf %37, %41 : vector<8x128xf32>
    %43 = arith.mulf %28, %35 : vector<8x128xf32>
    %44 = arith.divf %42, %43 : vector<8x128xf32>
    %c0_14 = arith.constant 0 : index
    %c0_15 = arith.constant 0 : index
    %45 = vector.load %arg2[%c0_14, %c0_15] : memref<8x128xf32, #tpu.memory_space<vmem>>, vector<8x128xf32>
    tpu.vector_store %arg2[%c0_14, %c0_15], %44 {strides = array<i32>} : memref<8x128xf32, #tpu.memory_space<vmem>>, vector<8x128xf32>,
    return
  }
  func.func @transform_0(%arg0: i32) -> (i32, i32) {
    %c0_i32 = arith.constant 0 : i32
    %c0_i32_0 = arith.constant 0 : i32
    return %arg0, %c0_i32 : i32, i32
  }
  func.func @transform_1(%arg0: i32) -> (i32, i32) {
    %c0_i32 = arith.constant 0 : i32
    %c0_i32_0 = arith.constant 0 : i32
    return %arg0, %c0_i32 : i32, i32
  }
}

</mosaic_0001>

<bundles_post_ra>
// kernel: tpu_custom_call.1
= control target key start
LH: loop header
LB: loop body
LE: loop exit
PB: predicated region body
PF: predicated region fallthrough
CT: control target
= control target key end

     0   :  { %6 = vsyncpa [#allocation3], 0  ;;  %s736_s0 = inlined_call_operand.hbm [shape: f32[16,128], index: 0, kind: input, shape index: {}]   ;;  %s737_s1 = inlined_call_operand.hbm [shape: f32[16,128], index: 1, kind: output, shape index: {}]  }
   0x1   :  { %8 = vsyncpa [#allocation3 + $0x1], 0 }
   0x2   :  { %9 = vsyncpa [#allocation4], 0 }
   0x3   :  { %11 = vsyncpa [#allocation4 + $0x1], 0  ;;  %s544_s6 = smov 0   ;;  %s546_s7 = smov 0  }
   0x4   :  { %s548_s8 = smov 0   ;;  %s550_s9 = smov 0  }
   0x5 LB: > { %s565_s10 = sadd.s32 4294967295, %s524_s9   ;;  %s348_s11 = sadd.s32 4294967294, %s524_s9   ;;  %s524_s9 = sphi %s550_s9, %s752_s9   ;;  %s520_s8 = sphi %s548_s8, %s751_s8   ;;  %s516_s7 = sphi %s546_s7, %s750_s7   ;;  %s512_s6 = sphi %s544_s6, %s749_s6  }
   0x6   : > { %s569_s12 = sadd.s32 1, %s524_s9   ;;  %s24_s13 = sadd.s32 1, %s520_s8 }
   0x7   : > { %s21_s14 = ssub.s32 %s524_s9, %s569_s12  ;;  %p31_p0 = scmp.ne.s32.totalorder %s520_s8, %s516_s7 }
   0x8   : > { %p22_p1 = scmp.eq.s32.totalorder %s21_s14, 0  ;;  %p32_p2 = scmp.eq.s32.totalorder %s524_s9, 0 }
   0x9   : > { %p37_p3 = scmp.ne.s32.totalorder %s516_s7, %s512_s6  ;;  %p38_p4 = scmp.eq.s32.totalorder %s565_s10, 0 }
   0xa   : > { %s581_s15 = scalar_select %p22_p1, %s520_s8, %s24_s13  }
   0xb   : > { %p583_p5 = por %p32_p2, %p31_p0  ;;  %p587_p6 = por %p38_p4, %p37_p3 }
   0xc   : > { %p61_p7 = scmp.eq.s32.totalorder %s565_s10, 1  ;;  %p67_p8 = scmp.eq.s32.totalorder %s348_s11, 1 }
   0xd   : > { %p380_p10 = scmp.lt.s32.totalorder %s524_s9, 2  ;;  %s87_s20 = sand.u32 1, %s520_s8  }
   0xe   : > { %p594_p11 = por %p61_p7, %p31_p0  ;;  %p598_p12 = por %p67_p8, %p37_p3 }
   0xf   : > { %s352_s21 = sshll.u32 %s524_s9, 7  ;;  %s351_s22 = sshll.u32 %s87_s20, 3 }
  0x10   : > { %s741_s18 = scalar_select %p594_p11, 1, 0 }
  0x11   : > { %s742_s19 = scalar_select %p598_p12, 1, 0 }
  0x12   : > { %s607_s25 = scalar_lea.hbm %s736_s0, %s352_s21  ;;  %s91_s26 = scalar_lea.vmem [#allocation2], %s351_s22 }
  0x13   : > { %s98_s27 = sshll.u32 %s91_s26, 4  ;;  %p611_p13 = pnand %p380_p10, %p583_p5  ;;  %s615_s27 = int_to_ptr.vmem [resolvable:$true] %s98_s27 }
  0x14   : > { %s88_s29 = scalar_lea.sflag [#allocation3], %s87_s20  ;;  %s428_s30 = scalar_lea.hbm %s607_s25, 128 }
  0x15   : > { %p429_p2 = scmp.ne.s32.totalorder %s607_s25, %s428_s30  ;;  %p430_p3 = pneg %p611_p13 }
  0x16   : > { %s433_s4 = scalar_lea.hbm %s736_s0, 256  ;;  %p434_p5 = scmp.lt.u32.totalorder %s607_s25, %s736_s0 }
  0x17   : > { %p431_p4 = pnand %p430_p3, %p429_p2  ;;  %p435_p8 = scmp.lt.u32.totalorder %s433_s4, %s428_s30 }
  0x18   : > { %p437_p9 = scmp.lt.u32.totalorder %s428_s30, %s607_s25 }
  0x19   : > { %p432_p7 = pneg %p431_p4  ;;  %p436_p10 = por %p435_p8, %p434_p5 }
  0x1b   : > { %p438_p0 = por %p437_p9, %p436_p10 }
  0x1d   : > { %p439_p1 = pnand %p438_p0, %p432_p7 }
  0x1f   : > { %442 = shalt.err (!%p439_p1)
}
  0x20   : > { %s443_s13 = scalar_lea.vmem %s615_s27, 128  ;;  %s526_s14 = smov [#allocation2]  }
  0x21   : > { %p444_p2 = scmp.ne.s32.totalorder %s615_s27, %s443_s13  ;;  %s448_s16 = sshll.u32 %s526_s14, 4  ;;  %s449_s16 = int_to_ptr.vmem [resolvable:$false] %s448_s16 }
  0x22   : > { %s450_s20 = scalar_lea.vmem %s449_s16, 256  ;;  %p451_p11 = scmp.lt.s32.totalorder %s615_s27, %s449_s16 }
  0x23   : > { %p446_p4 = pnand %p444_p2, %p430_p3  ;;  %p452_p5 = scmp.lt.s32.totalorder %s450_s20, %s443_s13 }
  0x25   : > { %p447_p12 = pneg %p446_p4  ;;  %p453_p8 = por %p452_p5, %p451_p11 }
  0x27   : > { %p454_p9 = pnand %p453_p8, %p447_p12 }
  0x29   : > { %457 = shalt.err (!%p454_p9)
}
  0x2a   : > { %375 = dma.hbm_to_vmem [thread:$0]  (!%p611_p13), %s607_s25, 128, %s615_s27, %s88_s29  }
  0x2b   : > { %p744_p0 = scmp.lt.s32.totalorder %s524_s9, 3  ;;  %p745_p1 = scmp.ge.s32.totalorder %s524_s9, 1 }
  0x2d   : > { %p104_p3 = pnand %p745_p1, %p744_p0 }
  0x2e   : > { %s649_s21 = sand.u32 (!%p104_p3), 1, %s516_s7  }
  0x2f   : > { %107 = sbr.rel (%p104_p3) target bundleno = 158 (0x9e), region = 24  ;;  %s354_s22 = sshll.u32 (!%p104_p3), %s649_s21, 3 }
  0x30   : > { %s110_s23 = scalar_lea.sflag (!%p104_p3), [#allocation3], %s649_s21  ;;  %s113_s24 = scalar_lea.vmem (!%p104_p3), [#allocation2], %s354_s22 }
  0x36   : > { %503 = dma.done.wait (%p587_p6), %s110_s23, 128  }
  0x37   : > { %505 = vsyncadd (%p587_p6), %s110_s23, 4294967168  ;;  %v659_v0 = vld [vmem:[%s113_s24] sm:$0xff]  ;;  %v527_v12 = vmov 683565275   ;;  %v528_v14 = vmov 2475754826  }
  0x38   : > { %v662_v1 = vmul.f32 3.1415927, %v659_v0  ;;  %v529_v16 = vmov 2131351028   ;;  %v530_v19 = vmov 2102212464  }
  0x39   : > { %v531_v24 = vmov 920167782   ;;  %v532_v28 = vmov 1326507024   ;;  %v133_v55 = vand.u32 2147483647, %v659_v0 }
  0x3a   : > { %v151_v2 = vand.u32 2139095040, %v662_v1  ;;  %v148_v5 = vand.u32 2147483647, %v662_v1  ;;  %vm150_vm7 = vcmp.lt.s32.totalorder %v662_v1, 0  ;;  %vm138_vm9 = vcmp.ge.f32.partialorder %v659_v0, 0.0  ;;  %s131_s17 = scalar_lea.vmem [#allocation5], %s354_s22 }
  0x3b   : > { %v134_v58 = vsub.f32 0.0, %v133_v55  ;;  %vm240_vm13 = vweird.f32 %v662_v1  ;;  %s278_s25 = sshll.u32 %s131_s17, 4  ;;  %s361_s26 = sshll.u32 %s565_s10, 7  ;;  %s689_s25 = int_to_ptr.vmem [resolvable:$true] %s278_s25 }
  0x3c   : > { %v152_v3 = vshrl.u32 %v151_v2, 23  ;;  %v155_v7 = vand.u32 8388607, %v148_v5  ;;  %vm149_vm8 = vcmp.le.f32.partialorder %v148_v5, 0.7853982  ;;  %s694_s29 = scalar_lea.hbm %s737_s1, %s361_s26  ;;  %s265_s30 = scalar_lea.sflag [#allocation4], %s649_s21 }
  0x3d   : > { %v135_v61 = vmul.f32 1.442695, %v134_v58  ;;  %s458_s2 = scalar_lea.vmem %s689_s25, 128  ;;  %p746_p11 = scmp.ne.s32.totalorder %s741_s18, 0 }
  0x3e   : > { %v356_v4 = vadd.s32 4294967169, %v152_v3  ;;  %v156_v18 = vor.u32 8388608, %v155_v7  ;;  %p459_p6 = scmp.ne.s32.totalorder %s689_s25, %s458_s2  ;;  %s533_s10 = smov [#allocation5]  }
  0x3f   : > { %420 = vpow2.f32 %v135_v61  ;;  %s462_s3 = sshll.u32 %s533_s10, 4  ;;  %s463_s3 = int_to_ptr.vmem [resolvable:$false] %s462_s3 }
  0x40   : > { %v158_v6 = vadd.s32 1, %v356_v4  ;;  %v196_v35 = vshll.u32 %v156_v18, 8  ;;  %p460_p12 = pnand %p459_p6, %p746_p11  ;;  %s464_s4 = scalar_lea.vmem %s463_s3, 256 }
  0x41   : > { %p465_p7 = scmp.lt.s32.totalorder %s689_s25, %s463_s3  ;;  %p466_p10 = scmp.lt.s32.totalorder %s464_s4, %s458_s2 }
  0x42   : > { %vm159_vm0 = vcmp.gt.s32.totalorder %v158_v6, 0  ;;  %p461_p13 = pneg %p460_p12 }
  0x43   : > { %v160_v8 = vsel %vm159_vm0, %v158_v6, 0  ;;  %p467_p2 = por %p466_p10, %p465_p7 }
  0x44   : > { %v162_v9 = vand.u32 31, %v160_v8  ;;  %v161_v10 = vshrl.u32 %v160_v8, 5 }
  0x45   : > { %p468_p4 = pnand %p467_p2, %p461_p13 }
  0x46   : > { %v163_v11 = vsub.s32 32, %v162_v9  ;;  %v165_v13 = vshll.u32 %v527_v12, %v162_v9  ;;  %v168_v15 = vshll.u32 %v528_v14, %v162_v9  ;;  %v171_v17 = vshll.u32 %v529_v16, %v162_v9 }
  0x47   : > { %v174_v20 = vshll.u32 %v530_v19, %v162_v9  ;;  %v177_v25 = vshll.u32 %v531_v24, %v162_v9  ;;  %vm180_vm1 = vcmp.lt.s32.totalorder %v161_v10, 1  ;;  %vm182_vm2 = vcmp.lt.s32.totalorder %v161_v10, 3 }
  0x48   : > { %v166_v21 = vshrl.u32 %v528_v14, %v163_v11  ;;  %v169_v22 = vshrl.u32 %v529_v16, %v163_v11  ;;  %v172_v23 = vshrl.u32 %v530_v19, %v163_v11  ;;  %v164_v26 = vshrl.u32 %v527_v12, %v163_v11 }
  0x49   : > { %v175_v27 = vshrl.u32 %v531_v24, %v163_v11  ;;  %v178_v29 = vshrl.u32 %v532_v28, %v163_v11  ;;  %vm183_vm3 = vcmp.lt.s32.totalorder %v161_v10, 4  ;;  %vm181_vm4 = vcmp.lt.s32.totalorder %v161_v10, 2  ;;  %v421_v11 = vpop.eup %420 }
  0x4a   : > { %v167_v30 = vor.u32 %v166_v21, %v165_v13  ;;  %v170_v31 = vor.u32 %v169_v22, %v168_v15  ;;  %v173_v32 = vor.u32 %v172_v23, %v171_v17  ;;  %v137_v16 = vmul.f32 %v421_v11, %v421_v11 }
  0x4b   : > { %v176_v33 = vor.u32 %v175_v27, %v174_v20  ;;  %v179_v34 = vor.u32 %v178_v29, %v177_v25  ;;  %v139_v17 = vmul.f32 2.0, %v421_v11 }
  0x4c   : > { %v184_v36 = vsel %vm180_vm1, %v164_v26, %v167_v30  ;;  %v185_v37 = vsel %vm183_vm3, %v173_v32, 2102212464  ;;  %v188_v38 = vsel %vm180_vm1, %v167_v30, %v170_v31  ;;  %v192_v41 = vsel %vm180_vm1, %v170_v31, %v173_v32 }
  0x4d   : > { %v186_v39 = vsel %vm182_vm2, %v170_v31, %v185_v37  ;;  %v189_v40 = vsel %vm183_vm3, %v176_v33, 920167782  ;;  %v193_v42 = vsel %vm183_vm3, %v179_v34, 1326507024  ;;  %v140_v22 = vadd.f32 1.0, %v139_v17 }
  0x4e   : > { %v190_v43 = vsel %vm182_vm2, %v173_v32, %v189_v40  ;;  %v194_v44 = vsel %vm182_vm2, %v176_v33, %v193_v42  ;;  %v187_v45 = vsel %vm181_vm4, %v184_v36, %v186_v39  ;;  %v141_v23 = vadd.f32 %v139_v17, %v137_v16 }
  0x4f   : > { %v191_v46 = vsel %vm181_vm4, %v188_v38, %v190_v43  ;;  %v195_v47 = vsel %vm181_vm4, %v192_v41, %v194_v44  ;;  %v203_v52 = vmul.u32 %v196_v35, %v187_v45  ;;  %v143_v24 = vmul.f32 2.0, %v137_v16 }
  0x50   : > { %v668_v48 = vmul.u32.u64.low %v196_v35, %v195_v47  ;;  %v669_v49 = vmul.u32.u64.high %v196_v35, %v195_v47, %v668_v48  ;;  %v671_v50 = vmul.u32.u64.low %v196_v35, %v191_v46  ;;  %v672_v51 = vmul.u32.u64.high %v196_v35, %v191_v46, %v671_v50 }
  0x51   : > { %v144_v28 = vadd.f32 %v143_v24, %v140_v22  ;;  %v145_v29 = vadd.f32 2.0, %v141_v23  ;;  %v253_v33 = vadd.f32 1.0, %v421_v11  ;;  %v252_v38 = vsel %vm138_vm9, %v421_v11, 1.0 }
  0x52   : > { %vm205_vm5 = vc.u32 %v669_v49, %v671_v50  ;;  %v206_v53 = vadd.s32 1, %v672_v51  ;;  %v204_v6 = vadd.s32 %v671_v50, %v669_v49  ;;  %v142_v39 = vsel %vm138_vm9, %v140_v22, %v141_v23 }
  0x53   : > { %v146_v34 = vsel %vm138_vm9, %v144_v28, %v145_v29  ;;  %v256_v5 = vmul.f32 0.2, %v252_v38  ;;  %v254_v43 = vmul.f32 %v142_v39, %v659_v0 }
  0x54   : > { %v207_v54 = vsel %vm205_vm5, %v206_v53, %v672_v51  ;;  %v260_v36 = vmul.f32 %v253_v33, %v146_v34 }
  0x55   : > { %v208_v56 = vadd.s32 %v207_v54, %v203_v52  ;;  %v257_v46 = vmul.f32 %v256_v5, %v146_v34  ;;  %v255_v49 = vmul.f32 %v254_v43, %v253_v33 }
  0x57   : > { %v209_v57 = vadd.s32 536870912, %v208_v56 }
  0x59   : > { %v210_v59 = vshrl.u32 %v209_v57, 30 }
  0x5b   : > { %v211_v60 = vshll.u32 %v210_v59, 30  ;;  %v234_v21 = vsub.s32 4, %v210_v59 }
  0x5d   : > { %v212_v62 = vsub.s32 %v208_v56, %v211_v60  ;;  %v235_v27 = vsel %vm150_vm7, %v234_v21, %v210_v59 }
  0x5e   : > { %v237_v32 = vsel %vm149_vm8, 0, %v235_v27 }
  0x5f   : > { %v214_v63 = vsub.s32 0, %v212_v62  ;;  %v241_v35 = vadd.s32 3, %v237_v32 }
  0x61   : > { %v357_v2 = vmin.u32 %v214_v63, %v212_v62  ;;  %v242_v37 = vand.u32 3, %v241_v35 }
  0x63   : > { %v216_v3 = vclz %v357_v2  ;;  %vm247_vm10 = vcmp.eq.s32.totalorder %v242_v37, 2  ;;  %vm244_vm11 = vcmp.eq.s32.totalorder %v242_v37, 0  ;;  %vm243_vm12 = vcmp.lt.s32.totalorder %v242_v37, 2 }
  0x65   : > { %v358_v4 = vadd.s32 4294967294, %v216_v3 }
  0x67   : > { %vm359_vm6 = vcmp.lt.s32.totalorder %v358_v4, 0 }
  0x68   : > { %v219_v7 = vsel %vm359_vm6, 0, %v358_v4 }
  0x69   : > { %v220_v8 = vsub.s32 32, %v219_v7  ;;  %v221_v9 = vshll.u32 %v212_v62, %v219_v7  ;;  %v224_v10 = vsub.s32 4294967266, %v219_v7 }
  0x6b   : > { %v222_v12 = vshrl.u32 %v204_v6, %v220_v8  ;;  %v225_v13 = vadd.s32 127, %v224_v10 }
  0x6d   : > { %v223_v14 = vor.u32 %v222_v12, %v221_v9  ;;  %v226_v15 = vshll.u32 %v225_v13, 23 }
  0x6f   : > { %v227_v18 = vor.u32 4788187, %v226_v15  ;;  %v230_v19 = vcvt.s32.f32 %v223_v14 }
  0x71   : > { %v228_v20 = vand.u32 2147483647, %v227_v18 }
  0x73   : > { %v231_v25 = vmul.f32 %v230_v19, %v228_v20 }
  0x75   : > { %v232_v26 = vxor.u32 2147483648, %v231_v25 }
  0x77   : > { %v233_v30 = vsel %vm150_vm7, %v232_v26, %v231_v25 }
  0x78   : > { %v236_v31 = vsel %vm149_vm8, %v662_v1, %v233_v30 }
  0x79   : > { %422 = vcosq.f32 %v236_v31 }
  0x7a   : > { %424 = vsinq.f32 %v236_v31 }
  0x7b   : > { %426 = vrcp.f32 %v260_v36 }
  0x83   : > { %v423_v40 = vpop.eup %422 }
  0x84   : > { %v425_v41 = vpop.eup %424  ;;  %v248_v42 = vxor.u32 2147483648, %v423_v40 }
  0x85   : > { %v245_v44 = vxor.u32 2147483648, %v425_v41  ;;  %v427_v52 = vpop.eup %426 }
  0x86   : > { %v249_v45 = vsel %vm247_vm10, %v248_v42, %v425_v41 }
  0x87   : > { %v246_v47 = vsel %vm244_vm11, %v423_v40, %v245_v44 }
  0x88   : > { %v250_v48 = vsel %vm243_vm12, %v246_v47, %v249_v45 }
  0x89   : > { %v251_v50 = vsel %vm240_vm13, nan, %v250_v48 }
  0x8a   : > { %v258_v51 = vmul.f32 %v257_v46, %v251_v50 }
  0x8c   : > { %v259_v53 = vadd.f32 %v258_v51, %v255_v49 }
  0x8e   : > { %v262_v0 = vmul.f32 %v427_v52, %v259_v53 }
  0x90   : > { %263 = vst [vmem:[%s131_s17] sm:$0xff] %v262_v0 }
  0x91   : > { %471 = shalt.err (!%p468_p4)
}
  0x92   : > { %s472_s5 = scalar_lea.hbm %s694_s29, 128  ;;  %s476_s14 = scalar_lea.hbm %s737_s1, 256 }
  0x93   : > { %p473_p5 = scmp.ne.s32.totalorder %s694_s29, %s472_s5  ;;  %p477_p0 = scmp.lt.u32.totalorder %s694_s29, %s737_s1 }
  0x94   : > { %p478_p1 = scmp.lt.u32.totalorder %s476_s14, %s472_s5  ;;  %p480_p6 = scmp.lt.u32.totalorder %s472_s5, %s694_s29 }
  0x95   : > { %p474_p8 = pnand %p473_p5, %p746_p11 }
  0x96   : > { %p479_p3 = por %p478_p1, %p477_p0 }
  0x97   : > { %p475_p9 = pneg %p474_p8 }
  0x98   : > { %p481_p12 = por %p480_p6, %p479_p3 }
  0x9a   : > { %p482_p13 = pnand %p481_p12, %p475_p9 }
  0x9c   : > { %485 = shalt.err (!%p482_p13)
}
  0x9d   : > { %370 = dma.vmem_to_hbm [thread:$0]  (%p746_p11), %s689_s25, 128, %s694_s29, %s265_s30  }
  0x9e PF: > { %s290_s21 = sand.u32 1, %s512_s6   ;;  %p747_p7 = scmp.ne.s32.totalorder %s742_s19, 0 }
  0x9f   : > { %p748_p10 = scmp.ge.s32.totalorder %s524_s9, 2  ;;  %s291_s22 = scalar_lea.sflag [#allocation4], %s290_s21 }
  0xa1   : > { %p377_p2 = pnand %p748_p10, %p747_p7 }
  0xa3   : > { %507 = dma.done.wait (!%p377_p2), %s291_s22, 128  }
  0xa4   : > { %509 = vsyncadd (!%p377_p2), %s291_s22, 4294967168  ;;  %p14_p4 = scmp.ge.s32.totalorder %s569_s12, 4   ;;  %s749_s6 = smov %s516_s7 }
  0xa5   : > { %s750_s7 = smov %s520_s8  ;;  %s751_s8 = smov %s581_s15 }
  0xa6   : > { %s752_s9 = smov %s569_s12  ;;  %16 = sbr.rel (!%p14_p4) target bundleno = 5 (0x5), region = 69 }
  0xad   :  { %296 = vsyncpa [#allocation3], 1 }
  0xae   :  { %298 = vsyncpa [#allocation3 + $0x1], 1 }
  0xaf   :  { %299 = vsyncpa [#allocation4], 1 }
  0xb0   :  { %301 = vsyncpa [#allocation4 + $0x1], 1 }

</bundles_post_ra>
